<compile_context>
chip_gen: v5e
topology: v5e:2x2
jax: 0.10.0
libtpu: 0.0.40
codegen_flags: <defaults>
</compile_context>

<pallas_src>
from functools import lru_cache

import jax
import jax.numpy as jnp
import numpy as np
from jax import lax
from jax.experimental import pallas as pl
from jax.experimental.pallas import tpu as pltpu


def _gx_kernel(bh_ref, x_ref, r_ref, b_ref, o_ref):
    """out_rows = (Bh_tile @ X) @ R + bias   (blur-H, then blur-W + 1x1 mix)."""
    t = jnp.dot(bh_ref[...], x_ref[...],
                preferred_element_type=jnp.float32)          # (TH, 2CW) f32
    y = jnp.dot(t.astype(jnp.bfloat16), r_ref[...],
                preferred_element_type=jnp.float32)          # (TH, 2CW) f32
    o_ref[...] = y + b_ref[...]                              # bias broadcasts over rows


@lru_cache(maxsize=None)
def _band_np(n, p):
    """Banded 0/1 matrix: band[i, j] = 1 if |i - j| <= p (zero padding baked in)."""
    i = np.arange(n)
    return (np.abs(i[:, None] - i[None, :]) <= p).astype(np.float32)


def _row_tile(h):
    """Rows per grid step: a multiple of 8 dividing H, giving >=2 steps when possible."""
    if h % 16 == 0:
        t = h // 2
        while t > 256:
            t //= 2
        if h % t == 0 and t % 8 == 0:
            return t
    return h


def self_similar_sc_forward(x, kernel_size, w11, b11):
    """Pallas equivalent of SelfSimilarSC.forward.

    x   : (C, H, W, 2) float32
    w11 : (C, C)   == conv1_11.weight[:, :, 0, 0]
    b11 : (C,)     == conv1_11.bias
    returns (C, H, W, 2) float32
    """
    c, h, w, two = x.shape
    assert two == 2
    # TODO(synk): even kernel_size changes spatial dims in the torch code; only odd supported here.
    assert kernel_size % 2 == 1
    p = kernel_size // 2
    lanes = 2 * c * w

    # ---- glue: (C, H, W, 2) -> (H, 2, C, W) -> (H, 2*C*W) slab, bf16 ----
    x_slab = jnp.transpose(x, (1, 3, 0, 2)).reshape(h, lanes).astype(jnp.bfloat16)

    # ---- operators (bands cached; only the small kron with w11 is per-call) ----
    bh_k = _band_np(h, p) / float(kernel_size)               # (H, H)  blur along H
    bw_k = _band_np(w, p) / float(kernel_size)               # (W, W)  blur along W
    bh_j = jnp.asarray(bh_k, dtype=jnp.bfloat16)
    # R[(r,c,w),(r,o,v)] = w11[o,c] * Bw_k[w,v]   -> W-blur + 1x1 channel mix, block-diag over r
    r_op = jnp.kron(jnp.eye(2, dtype=jnp.float32),
                    jnp.kron(jnp.transpose(w11).astype(jnp.float32),
                             jnp.asarray(bw_k))).astype(jnp.bfloat16)     # (2CW, 2CW)
    bias_row = jnp.broadcast_to(b11.astype(jnp.float32)[None, :, None],
                                (2, c, w)).reshape(1, lanes)              # (1, 2CW) f32

    th = _row_tile(h)
    grid = (h // th,)

    # explicit scoped-VMEM budget: blocks (double-buffered) + generous headroom
    blk_bytes = (th * h * 2) + (h * lanes * 2) + (lanes * lanes * 2) \
        + (lanes * 4) + (th * lanes * 4)
    vmem_limit = int(min(max(4 * blk_bytes, 1 << 20), 48 << 20))

    out_slab = pl.pallas_call(
        _gx_kernel,
        out_shape=jax.ShapeDtypeStruct((h, lanes), jnp.float32),
        grid_spec=pltpu.PrefetchScalarGridSpec(
            num_scalar_prefetch=0,
            grid=grid,
            in_specs=[
                pl.BlockSpec((th, h), lambda i: (i, 0)),          # Bh rows for this tile
                pl.BlockSpec((h, lanes), lambda i: (0, 0)),       # full X slab (K dim), resident
                pl.BlockSpec((lanes, lanes), lambda i: (0, 0)),   # folded W-blur + 1x1 mix
                pl.BlockSpec((1, lanes), lambda i: (0, 0)),       # bias row
            ],
            out_specs=pl.BlockSpec((th, lanes), lambda i: (i, 0)),
        ),
        compiler_params=pltpu.CompilerParams(
            dimension_semantics=("parallel",),
            vmem_limit_bytes=vmem_limit,
        ),
    )(bh_j, x_slab, r_op, bias_row)

    # ---- glue: (H, 2, C, W) -> (C, H, W, 2) ----
    return jnp.transpose(out_slab.reshape(h, 2, c, w), (2, 0, 3, 1))


def reference_forward(x, kernel_size, w11, b11):
    """Pure-JAX reference mirroring the PyTorch module op-by-op."""
    xr = jnp.transpose(x, (3, 0, 1, 2))                          # (2, C, H, W)
    k = kernel_size
    box = jnp.ones((1, 1, k, k), jnp.float32) / float(k * k)

    def blur(img):                                               # (C, H, W)
        return lax.conv_general_dilated(
            img[:, None, :, :], box, window_strides=(1, 1),
            padding=[(k // 2, k // 2), (k // 2, k // 2)])[:, 0]

    blurred = jnp.stack([blur(xr[0]), blur(xr[1])], axis=0)      # (2, C, H, W)
    mixed = jnp.einsum('oc,rchw->rohw', w11, blurred) + b11[None, :, None, None]
    return jnp.transpose(mixed, (1, 2, 3, 0))                    # (C, H, W, 2)


if __name__ == "__main__":
    C, H, W = 4, 16, 16
    kernel_size = 3

    key = jax.random.PRNGKey(0)
    kx, kw, kb = jax.random.split(key, 3)
    x = jax.random.normal(kx, (C, H, W, 2), dtype=jnp.float32)
    # deterministic synthetic parameters for conv1_11 (shapes from __init__)
    w11 = 0.5 * jax.random.normal(kw, (C, C), dtype=jnp.float32)   # Conv2d(C, C, 1) weight
    b11 = 0.1 * jax.random.normal(kb, (C,), dtype=jnp.float32)     # Conv2d bias

    out = self_similar_sc_forward(x, kernel_size, w11, b11)
    out = jax.block_until_ready(out)
    assert out.shape == (C, H, W, 2)

    ref = reference_forward(x, kernel_size, w11, b11)
    np.testing.assert_allclose(np.asarray(out), np.asarray(ref), rtol=5e-2, atol=5e-2)

    print("KERNEL_OK")
</pallas_src>

<mosaic_0001>
module attributes {stable_mosaic.version = 11 : i64} {
  func.func @_gx_kernel(%arg0: i32, %arg1: memref<8x16xbf16, #tpu.memory_space<vmem>>, %arg2: memref<16x128xbf16, #tpu.memory_space<vmem>>, %arg3: memref<128x128xbf16, #tpu.memory_space<vmem>>, %arg4: memref<1x128xf32, #tpu.memory_space<vmem>>, %arg5: memref<8x128xf32, #tpu.memory_space<vmem>>) attributes {dimension_semantics = [#tpu.dimension_semantics<parallel>], iteration_bounds = array<i64: 2>, scalar_prefetch = 0 : i64, scratch_operands = 0 : i64, tpu.core_type = #tpu.core_type<tc>, window_params = [{transform_indices = @transform_0, window_bounds = array<i64: 8, 16>}, {pipeline_mode = #tpu.pipeline_mode<synchronous>, transform_indices = @transform_1, window_bounds = array<i64: 16, 128>}, {pipeline_mode = #tpu.pipeline_mode<synchronous>, transform_indices = @transform_2, window_bounds = array<i64: 128, 128>}, {pipeline_mode = #tpu.pipeline_mode<synchronous>, transform_indices = @transform_3, window_bounds = array<i64: 1, 128>}, {transform_indices = @transform_4, window_bounds = array<i64: 8, 128>}]} {
    %c0 = arith.constant 0 : index
    %c0_0 = arith.constant 0 : index
    %0 = vector.load %arg1[%c0, %c0_0] : memref<8x16xbf16, #tpu.memory_space<vmem>>, vector<8x16xbf16>
    %c0_1 = arith.constant 0 : index
    %c0_2 = arith.constant 0 : index
    %1 = vector.load %arg2[%c0_1, %c0_2] : memref<16x128xbf16, #tpu.memory_space<vmem>>, vector<16x128xbf16>
    %cst = arith.constant dense<0.000000e+00> : vector<8x128xf32>
    %2 = tpu.matmul %0, %1, %cst {dimension_numbers = #tpu.dot_dimension_numbers<[1], [0], [0], [1], [0, 0, 1, 1], [], []>} : vector<8x16xbf16>, vector<16x128xbf16>, vector<8x128xf32> -> vector<8x128xf32>
    %3 = arith.truncf %2 : vector<8x128xf32> to vector<8x128xbf16>
    %c0_3 = arith.constant 0 : index
    %c0_4 = arith.constant 0 : index
    %4 = vector.load %arg3[%c0_3, %c0_4] : memref<128x128xbf16, #tpu.memory_space<vmem>>, vector<128x128xbf16>
    %cst_5 = arith.constant dense<0.000000e+00> : vector<8x128xf32>
    %5 = tpu.matmul %3, %4, %cst_5 {dimension_numbers = #tpu.dot_dimension_numbers<[1], [0], [0], [1], [0, 0, 1, 1], [], []>} : vector<8x128xbf16>, vector<128x128xbf16>, vector<8x128xf32> -> vector<8x128xf32>
    %c0_6 = arith.constant 0 : index
    %c0_7 = arith.constant 0 : index
    %6 = vector.load %arg4[%c0_6, %c0_7] : memref<1x128xf32, #tpu.memory_space<vmem>>, vector<1x128xf32>
    %7 = vector.broadcast %6 : vector<1x128xf32> to vector<8x128xf32>
    %8 = arith.addf %5, %7 : vector<8x128xf32>
    %c0_8 = arith.constant 0 : index
    %c0_9 = arith.constant 0 : index
    %9 = vector.load %arg5[%c0_8, %c0_9] : memref<8x128xf32, #tpu.memory_space<vmem>>, vector<8x128xf32>
    tpu.vector_store %arg5[%c0_8, %c0_9], %8 {strides = array<i32>} : memref<8x128xf32, #tpu.memory_space<vmem>>, vector<8x128xf32>,
    return
  }
  func.func @transform_0(%arg0: i32) -> (i32, i32) {
    %c0_i32 = arith.constant 0 : i32
    %c0_i32_0 = arith.constant 0 : i32
    return %arg0, %c0_i32 : i32, i32
  }
  func.func @transform_1(%arg0: i32) -> (i32, i32) {
    %c0_i32 = arith.constant 0 : i32
    %c0_i32_0 = arith.constant 0 : i32
    %c0_i32_1 = arith.constant 0 : i32
    return %c0_i32, %c0_i32_0 : i32, i32
  }
  func.func @transform_2(%arg0: i32) -> (i32, i32) {
    %c0_i32 = arith.constant 0 : i32
    %c0_i32_0 = arith.constant 0 : i32
    %c0_i32_1 = arith.constant 0 : i32
    return %c0_i32, %c0_i32_0 : i32, i32
  }
  func.func @transform_3(%arg0: i32) -> (i32, i32) {
    %c0_i32 = arith.constant 0 : i32
    %c0_i32_0 = arith.constant 0 : i32
    %c0_i32_1 = arith.constant 0 : i32
    return %c0_i32, %c0_i32_0 : i32, i32
  }
  func.func @transform_4(%arg0: i32) -> (i32, i32) {
    %c0_i32 = arith.constant 0 : i32
    %c0_i32_0 = arith.constant 0 : i32
    return %arg0, %c0_i32 : i32, i32
  }
}

</mosaic_0001>

<bundles_post_ra>
// kernel: tpu_custom_call.1
= control target key start
LH: loop header
LB: loop body
LE: loop exit
PB: predicated region body
PF: predicated region fallthrough
CT: control target
= control target key end

     0   :  { %9 = vsyncpa [#allocation3], 0  ;;  %s935_s0 = inlined_call_operand.hbm [shape: bf16[16,16], index: 0, kind: input, shape index: {}]   ;;  %s936_s1 = inlined_call_operand.hbm [shape: bf16[16,128], index: 1, kind: input, shape index: {}]   ;;  %s937_s2 = inlined_call_operand.hbm [shape: bf16[128,128], index: 2, kind: input, shape index: {}]   ;;  %s938_s3 = inlined_call_operand.vmem [shape: f32[1,128], index: 3, kind: input, shape index: {}]   ;;  %s939_s4 = inlined_call_operand.hbm [shape: f32[16,128], index: 4, kind: output, shape index: {}]  }
   0x1   :  { %11 = vsyncpa [#allocation3 + $0x1], 0 }
   0x2   :  { %12 = vsyncpa [#allocation6], 0 }
   0x3   :  { %13 = vsyncpa [#allocation4], 0 }
   0x4   :  { %15 = vsyncpa [#allocation4 + $0x1], 0  ;;  %s786_s15 = smov 0   ;;  %s788_s16 = smov 0  }
   0x5   :  { %s790_s17 = smov 0   ;;  %s792_s18 = smov 0  }
   0x6 LB: > { %s152_s21 = sshll.u32 %s936_s1, 4  ;;  %s810_s22 = sadd.s32 4294967295, %s755_s18   ;;  %s755_s18 = sphi %s792_s18, %s950_s18   ;;  %s751_s17 = sphi %s790_s17, %s949_s17   ;;  %s747_s16 = sphi %s788_s16, %s948_s16   ;;  %s743_s15 = sphi %s786_s15, %s947_s15   ;;  %s153_s21 = int_to_ptr.hbm [resolvable:$true] %s152_s21 }
   0x7   : > { %p464_p0 = scmp.ge.s32.totalorder %s755_s18, 1  ;;  %p42_p1 = scmp.eq.s32.totalorder %s810_s22, 0 }
   0x8   : > { %p141_p2 = scmp.lt.s32.totalorder %s755_s18, 3  ;;  %s757_s24 = smov [#allocation5]  }
   0x9   : > { %s154_s25 = sshll.u32 %s757_s24, 4  ;;  %s166_s28 = sshll.u32 %s937_s2, 4  ;;  %s155_s25 = int_to_ptr.vmem [resolvable:$true] %s154_s25  ;;  %s167_s28 = int_to_ptr.hbm [resolvable:$true] %s166_s28 }
   0xa   : > { %p815_p3 = pnand %p464_p0, %p141_p2  ;;  %s758_s29 = smov [#allocation7]  }
   0xb   : > { %s168_s30 = sshll.u32 %s758_s29, 4  ;;  %s759_s5 = smov 64   ;;  %s169_s30 = int_to_ptr.vmem [resolvable:$true] %s168_s30 }
   0xc   : > { %p537_p4 = pneg %p815_p3  ;;  %s760_s6 = smov 4  }
   0xd   : > { %s463_s7 = sadd.s32 4294967294, %s755_s18   ;;  %s829_s8 = sadd.s32 1, %s755_s18  }
   0xe   : > { %p538_p6 = pnand %p537_p4, %p42_p1  ;;  %s25_s9 = ssub.s32 %s755_s18, %s829_s8 }
   0xf   : > { %s28_s10 = sadd.s32 1, %s751_s17  ;;  %p26_p7 = scmp.eq.s32.totalorder %s25_s9, 0 }
  0x10   : > { %540 = dma.hbm_to_vmem [thread:$0]  (!%p538_p6), %s153_s21, 128, %s155_s25, [#allocation6], %s759_s5, %s759_s5, %s760_s6  }
  0x11   : > { %543 = dma.hbm_to_vmem [thread:$0]  (!%p538_p6), %s167_s28, 1024, %s169_s30, [#allocation6], %s759_s5, %s759_s5, %s760_s6  }
  0x12   : > { %p35_p8 = scmp.ne.s32.totalorder %s751_s17, %s747_s16  ;;  %p36_p9 = scmp.eq.s32.totalorder %s755_s18, 0 }
  0x13   : > { %p41_p10 = scmp.ne.s32.totalorder %s747_s16, %s743_s15  ;;  %p128_p13 = scmp.eq.s32.totalorder %s810_s22, 1 }
  0x14   : > { %s840_s11 = scalar_select %p26_p7, %s751_s17, %s28_s10  }
  0x15   : > { %p842_p11 = por %p36_p9, %p35_p8  ;;  %p848_p12 = por %p42_p1, %p41_p10 }
  0x16   : > { %p134_p0 = scmp.eq.s32.totalorder %s463_s7, 1  ;;  %p554_p2 = scmp.lt.s32.totalorder %s755_s18, 2 }
  0x17   : > { %s185_s14 = sand.u32 1, %s751_s17   ;;  %p855_p4 = por %p128_p13, %p35_p8 }
  0x18   : > { %p859_p6 = por %p134_p0, %p41_p10  ;;  %s468_s21 = sshll.u32 %s185_s14, 2 }
  0x19   : > { %s469_s24 = sshll.u32 %s755_s18, 2  ;;  %s189_s28 = scalar_lea.vmem [#allocation2], %s468_s21 }
  0x1a   : > { %s193_s27 = scalar_lea.hbm %s935_s0, %s469_s24  ;;  %s197_s29 = sshll.u32 %s189_s28, 4  ;;  %s198_s29 = int_to_ptr.vmem [resolvable:$true] %s197_s29 }
  0x1b   : > { %s195_s30 = sshll.u32 %s193_s27, 4  ;;  %p869_p7 = pnand %p554_p2, %p842_p11  ;;  %s196_s30 = int_to_ptr.hbm [resolvable:$true] %s195_s30 }
  0x1c   : > { %s186_s6 = scalar_lea.sflag [#allocation3], %s185_s14  ;;  %s655_s7 = sshra.s32 %s196_s30, 4  ;;  %s656_s7 = int_to_ptr.hbm [resolvable:$true] %s655_s7 }
  0x1d   : > { %s657_s9 = scalar_lea.hbm %s656_s7, 4  ;;  %p659_p9 = pneg %p869_p7 }
  0x1e   : > { %p658_p8 = scmp.ne.s32.totalorder %s656_s7, %s657_s9  ;;  %s662_s24 = scalar_lea.hbm %s935_s0, 8 }
  0x1f   : > { %p663_p11 = scmp.lt.s32.totalorder %s656_s7, %s935_s0  ;;  %p664_p0 = scmp.lt.s32.totalorder %s662_s24, %s657_s9 }
  0x20   : > { %p660_p10 = pnand %p659_p9, %p658_p8 }
  0x21   : > { %p665_p2 = por %p664_p0, %p663_p11 }
  0x22   : > { %p661_p13 = pneg %p660_p10 }
  0x24   : > { %p666_p5 = pnand %p665_p2, %p661_p13 }
  0x26   : > { %669 = shalt.err (!%p666_p5)
}
  0x27   : > { %547 = dma.hbm_to_vmem [thread:$0]  (!%p869_p7), %s196_s30, 64, %s198_s29, %s186_s6  }
  0x28   : > { %206 = sbr.rel (%p815_p3) target bundleno = 314 (0x13a), region = 36  ;;  %s886_s14 = sand.u32 (!%p815_p3), 1, %s747_s16  }
  0x29   : > { %s471_s26 = sshll.u32 (!%p815_p3), %s886_s14, 2  ;;  %s209_s27 = scalar_lea.sflag (!%p815_p3), [#allocation3], %s886_s14 }
  0x2a   : > { %s212_s28 = scalar_lea.vmem (!%p815_p3), [#allocation2], %s471_s26 }
  0x2d   : > { %730 = dma.done.wait (%p848_p12), %s209_s27, 64  }
  0x2e   : > { %732 = vsyncadd (%p848_p12), %s209_s27, 4294967232 }
  0x2f   : > { %734 = dma.done.wait (%p42_p1), [#allocation6], 1152  }
  0x30   : > { %736 = vsyncadd (%p42_p1), [#allocation6], 4294966144  ;;  %v516_v0 = vld [vmem:[#allocation5] sm:$0xff]  ;;  %v249_v2 = vld [vmem:[%s212_s28] sm:$0xf]  ;;  %vm258_vm0 = vcmask 130048  }
  0x31   : > { %v524_v1 = vld [vmem:[#allocation7 + $0x38] sm:$0xff]  ;;  %269 = vmatpush.bf16.msra.mxu0 %v516_v0  ;;  %v523_v3 = vld [vmem:[#allocation7 + $0x30] sm:$0xff]  ;;  %v522_v4 = vld [vmem:[#allocation7 + $0x28] sm:$0xff]  ;;  %s513_s23 = sshll.u32 %s810_s22, 3  ;;  %s474_s13 = sshll.u32 %s886_s14, 3 }
  0x32   : > { %344 = vmatpush.bf16.msra.mxu1 %v524_v1  ;;  %v521_v5 = vld [vmem:[#allocation7 + $0x20] sm:$0xff]  ;;  %v520_v6 = vld [vmem:[#allocation7 + $0x18] sm:$0xff]  ;;  %v519_v7 = vld [vmem:[#allocation7 + $0x10] sm:$0xff]  ;;  %s369_s5 = scalar_lea.hbm %s939_s4, %s513_s23  ;;  %s247_s9 = scalar_lea.vmem [#allocation8], %s474_s13 }
  0x33   : > { %v518_v8 = vld [vmem:[#allocation7 + $0x8] sm:$0xff]  ;;  %v517_v9 = vld [vmem:[#allocation7] sm:$0xff]  ;;  %v594_v13 = vld [vmem:[%s938_s3] ss:$0 sm:$0xff]  ;;  %s371_s10 = sshll.u32 %s247_s9, 4  ;;  %s373_s21 = sshll.u32 %s369_s5, 4  ;;  %s372_s10 = int_to_ptr.vmem [resolvable:$true] %s371_s10  ;;  %s374_s21 = int_to_ptr.hbm [resolvable:$true] %s373_s21 }
  0x34   : > { %479 = vmatmul.msk.bf16.vlgmr.msra.gmra.mxu0 %vm258_vm0, %v249_v2  ;;  %s359_s24 = scalar_lea.sflag [#allocation4], %s886_s14  ;;  %s699_s22 = sshra.s32 %s374_s21, 4  ;;  %s700_s22 = int_to_ptr.hbm [resolvable:$true] %s699_s22 }
  0x35   : > { %s701_s25 = scalar_lea.hbm %s700_s22, 8  ;;  %s705_s27 = scalar_lea.hbm %s939_s4, 16 }
  0x36   : > { %345 = vmatpush.bf16.msra.mxu1 %v523_v3  ;;  %p702_p1 = scmp.ne.s32.totalorder %s700_s22, %s701_s25  ;;  %p706_p12 = scmp.lt.s32.totalorder %s700_s22, %s939_s4 }
  0x37   : > { %p707_p7 = scmp.lt.s32.totalorder %s705_s27, %s701_s25 }
  0x38   : > { %p703_p3 = pnand %p702_p1, %p855_p4 }
  0x39   : > { %p708_p8 = por %p707_p7, %p706_p12 }
  0x3a   : > { %346 = vmatpush.bf16.msra.mxu1 %v522_v4  ;;  %p704_p5 = pneg %p703_p3 }
  0x3c   : > { %p709_p9 = pnand %p708_p8, %p704_p5 }
  0x3e   : > { %347 = vmatpush.bf16.msra.mxu1 %v521_v5 }
  0x42   : > { %348 = vmatpush.bf16.msra.mxu1 %v520_v6 }
  0x46   : > { %349 = vmatpush.bf16.msra.mxu1 %v519_v7 }
  0x4a   : > { %350 = vmatpush.bf16.msra.mxu1 %v518_v8 }
  0x4e   : > { %351 = vmatpush.bf16.msra.mxu1 %v517_v9 }
  0xb1   : > { %v271_v10 = vpop.f32.mrf.mxu0 }
  0xb2   : > { %v275_v11 = vpack.c.bf16 %v271_v10, %v271_v10 }
  0xb4   : > { %352 = vmatmul.bf16.vlgmr.msra.gmra.mxu1 %v275_v11 }
  0xb9   : > { %v273_v12 = vpop.f32.mrf.mxu0 }
 0x131   : > { %v353_v14 = vpop.f32.mrf.mxu1 }
 0x132   : > { %v354_v15 = vadd.f32 %v594_v13, %v353_v14 }
 0x134   : > { %357 = vst [vmem:[%s247_s9] sm:$0xff] %v354_v15 }
 0x135   : > { %712 = shalt.err (!%p709_p9)
}
 0x136   : > { %535 = dma.vmem_to_hbm [thread:$0]  (%p855_p4), %s372_s10, 128, %s374_s21, %s359_s24  }
 0x139   : > { %v355_v16 = vpop.f32.mrf.mxu1 }
 0x13a PF: > { %s385_s14 = sand.u32 1, %s743_s15   ;;  %p946_p10 = scmp.ge.s32.totalorder %s755_s18, 2 }
 0x13b   : > { %s386_s13 = scalar_lea.sflag [#allocation4], %s385_s14 }
 0x13c   : > { %p549_p13 = pnand %p946_p10, %p859_p6 }
 0x13e   : > { %p550_p11 = pneg %p549_p13 }
 0x140   : > { %738 = dma.done.wait (%p550_p11), %s386_s13, 128  }
 0x141   : > { %740 = vsyncadd (%p550_p11), %s386_s13, 4294967168  ;;  %p18_p0 = scmp.ge.s32.totalorder %s829_s8, 4   ;;  %s947_s15 = smov %s747_s16 }
 0x142   : > { %s948_s16 = smov %s751_s17  ;;  %s949_s17 = smov %s840_s11 }
 0x143   : > { %s950_s18 = smov %s829_s8  ;;  %20 = sbr.rel (!%p18_p0) target bundleno = 6 (0x6), region = 89 }
 0x148   :  { %392 = vsyncpa [#allocation3], 1 }
 0x149   :  { %394 = vsyncpa [#allocation3 + $0x1], 1 }
 0x14a   :  { %395 = vsyncpa [#allocation6], 1 }
 0x14b   :  { %396 = vsyncpa [#allocation4], 1 }
 0x14c   :  { %398 = vsyncpa [#allocation4 + $0x1], 1 }

</bundles_post_ra>
